<compile_context>
chip_gen: v7x
topology: tpu7x:2x2x1
jax: 0.10.0
libtpu: 0.0.40
codegen_flags: <defaults>
</compile_context>

<pallas_src>
import numpy as np
import jax
import jax.numpy as jnp
from jax.experimental import pallas as pl
from jax.experimental.pallas import tpu as pltpu


def _round_up(a, b):
    return ((a + b - 1) // b) * b


# ----------------------------------------------------------------------------
# Glue: BN folding (matches QConvBNReLU.fold_bn, bn_affine=True) and im2col.
# ----------------------------------------------------------------------------
def _fold_bn(weight, bias, bn_weight, bn_bias, running_mean, running_var, eps):
    std = jnp.sqrt(running_var + eps)
    gamma = bn_weight / std
    w_f = weight * gamma[:, None, None, None]
    if bias is not None:
        b_f = gamma * bias - gamma * running_mean + bn_bias
    else:
        b_f = bn_bias - gamma * running_mean
    return w_f, b_f


def _im2col(x, kh, kw, stride, padding, dilation):
    """x: (N, Ci, H, W) -> patches (Ci*Kh*Kw, N*Ho*Wo), row order (ci, kh, kw)."""
    n, ci, h, w = x.shape
    sh, sw = stride
    ph, pw = padding
    dh, dw = dilation
    ho = (h + 2 * ph - dh * (kh - 1) - 1) // sh + 1
    wo = (w + 2 * pw - dw * (kw - 1) - 1) // sw + 1
    xp = jnp.pad(x, ((0, 0), (0, 0), (ph, ph), (pw, pw)))
    taps = []
    for ih in range(kh):
        for iw in range(kw):
            h0, w0 = ih * dh, iw * dw
            taps.append(xp[:, :,
                           h0:h0 + (ho - 1) * sh + 1:sh,
                           w0:w0 + (wo - 1) * sw + 1:sw])      # (N, Ci, Ho, Wo)
    p = jnp.stack(taps, axis=2)                                 # (N, Ci, T, Ho, Wo)
    p = p.transpose(1, 2, 0, 3, 4)                              # (Ci, T, N, Ho, Wo)
    return p.reshape(ci * kh * kw, n * ho * wo), ho, wo


# ----------------------------------------------------------------------------
# Pallas kernel: ACC(tco, tm) += W(tco, tk) @ P(tk, tm);  finalize: +bias, store.
# ----------------------------------------------------------------------------
def _conv_matmul_kernel(w_ref, p_ref, b_ref, o_ref, acc_ref):
    @pl.when(pl.program_id(2) == 0)
    def _init():
        acc_ref[...] = jnp.zeros_like(acc_ref)

    acc_ref[...] += jnp.dot(w_ref[...], p_ref[...],
                            preferred_element_type=jnp.float32)

    @pl.when(pl.program_id(2) == pl.num_programs(2) - 1)
    def _finalize():
        o_ref[...] = (acc_ref[...] + b_ref[...]).astype(o_ref.dtype)


def qconv_bn_relu_forward(x, weight, bias, bn_weight, bn_bias,
                          running_mean, running_var, *,
                          stride=1, padding=0, dilation=1, groups=1,
                          eps=1e-5, tile_m=1024, tile_co=256, tile_k=512):
    """Pallas equivalent of QConvBNReLU.forward(x, quant_mode=False).

    Returns (out, None, 32) to mirror the PyTorch module's return tuple.
    """
    assert groups == 1  # TODO(synk): grouped conv not implemented (module default groups=1)
    if isinstance(stride, int):
        stride = (stride, stride)
    if isinstance(padding, int):
        padding = (padding, padding)
    if isinstance(dilation, int):
        dilation = (dilation, dilation)

    co, ci, kh, kw = weight.shape
    n = x.shape[0]
    out_dtype = x.dtype

    w_f, b_f = _fold_bn(weight.astype(jnp.float32),
                        None if bias is None else bias.astype(jnp.float32),
                        bn_weight.astype(jnp.float32), bn_bias.astype(jnp.float32),
                        running_mean.astype(jnp.float32),
                        running_var.astype(jnp.float32), eps)

    # bf16 feeds the MXU at full rate and halves patch/weight HBM bytes;
    # accumulation stays in f32 inside the kernel.
    p, ho, wo = _im2col(x.astype(jnp.bfloat16), kh, kw, stride, padding, dilation)
    k = ci * kh * kw
    m = n * ho * wo

    # ---- tile selection: validated to (8,128) multiples; >=2 parallel grid
    #      steps so megacore / both v7x TensorCores have work ----
    lane, sub = 128, 8
    tile_m = max(lane, (int(tile_m) // lane) * lane)
    tile_k = max(lane, (int(tile_k) // lane) * lane)
    tile_co = max(sub, (int(tile_co) // sub) * sub)

    tm = min(tile_m, _round_up(m, lane))
    if m > lane and pl.cdiv(m, tm) < 2:           # guarantee >=2 M grid steps
        tm = _round_up(pl.cdiv(m, 2), lane)
    m_pad = _round_up(m, tm)

    if k > tile_k:                                # K reduction grid axis
        tk = tile_k
        k_pad = _round_up(k, tk)
    else:
        k_pad = _round_up(k, sub)
        tk = k_pad

    co_pad = _round_up(co, sub)
    if co_pad > tile_co:                          # Co parallel grid axis
        tco = tile_co
        co_pad = _round_up(co, tco)
    else:
        tco = co_pad

    n_co, n_m, n_k = co_pad // tco, m_pad // tm, k_pad // tk

    # Zero-padded K/Co contribute nothing; padded M columns are sliced off below.
    # TODO(synk): structural follow-up — move the Kh*Kw tap loop into the kernel
    # (per-tap (Co,Ci)@(Ci,tm) accumulation) so the Kh*Kw-expanded im2col buffer
    # (and this pad pass) is never materialized in HBM.
    p = jnp.pad(p, ((0, k_pad - k), (0, m_pad - m)))
    w_mat = jnp.pad(w_f.reshape(co, k).astype(jnp.bfloat16),
                    ((0, co_pad - co), (0, k_pad - k)))
    b_col = jnp.pad(b_f.reshape(co, 1).astype(jnp.float32),
                    ((0, co_pad - co), (0, 0)))

    # Constant-indexed (resident) operands: single buffer -> no duplicated VMEM.
    if n_co == 1 and n_k == 1:
        w_spec = pl.BlockSpec((tco, tk), lambda i, j, kk: (i, kk),
                              pipeline_mode=pl.Buffered(1))
    else:
        w_spec = pl.BlockSpec((tco, tk), lambda i, j, kk: (i, kk))
    if n_co == 1:
        b_spec = pl.BlockSpec((tco, 1), lambda i, j, kk: (i, 0),
                              pipeline_mode=pl.Buffered(1))
    else:
        b_spec = pl.BlockSpec((tco, 1), lambda i, j, kk: (i, 0))
    # Tiny-K layers (e.g. first conv) are DMA/latency bound: deepen the patch
    # pipeline when there are enough grid steps to exploit it.
    if n_k == 1 and k_pad <= 256 and (n_co * n_m * n_k) >= 3:
        p_spec = pl.BlockSpec((tk, tm), lambda i, j, kk: (kk, j),
                              pipeline_mode=pl.Buffered(3))
    else:
        p_spec = pl.BlockSpec((tk, tm), lambda i, j, kk: (kk, j))

    out = pl.pallas_call(
        _conv_matmul_kernel,
        out_shape=jax.ShapeDtypeStruct((co_pad, m_pad), out_dtype),
        grid=(n_co, n_m, n_k),
        in_specs=[w_spec, p_spec, b_spec],
        out_specs=pl.BlockSpec((tco, tm), lambda i, j, kk: (i, j)),
        scratch_shapes=[pltpu.VMEM((tco, tm), jnp.float32)],
        compiler_params=pltpu.CompilerParams(
            dimension_semantics=("parallel", "parallel", "arbitrary"),
            vmem_limit_bytes=48 * 1024 * 1024),
    )(w_mat, p, b_col)

    out = out[:co, :m].reshape(co, n, ho, wo).transpose(1, 0, 2, 3)
    return out, None, 32


# ----------------------------------------------------------------------------
# Pure-JAX reference (BN-folded f32 conv2d) for a sanity check.
# ----------------------------------------------------------------------------
def _reference(x, weight, bias, bn_w, bn_b, rm, rv, stride, padding, dilation,
               eps=1e-5):
    w_f, b_f = _fold_bn(weight, bias, bn_w, bn_b, rm, rv, eps)
    out = jax.lax.conv_general_dilated(
        x.astype(jnp.float32), w_f.astype(jnp.float32),
        window_strides=(stride, stride),
        padding=[(padding, padding), (padding, padding)],
        rhs_dilation=(dilation, dilation),
        dimension_numbers=("NCHW", "OIHW", "NCHW"))
    return out + b_f[None, :, None, None]


if __name__ == "__main__":
    key = jax.random.PRNGKey(0)

    def make_params(key, n, ci, co, ksz, h, w):
        ks = jax.random.split(key, 8)
        x = jax.random.normal(ks[0], (n, ci, h, w), jnp.float32)
        weight = jax.random.normal(ks[1], (co, ci, ksz, ksz), jnp.float32) * 0.1
        bias = jax.random.normal(ks[2], (co,), jnp.float32) * 0.1
        bn_w = 1.0 + jax.random.normal(ks[3], (co,), jnp.float32) * 0.1
        bn_b = jax.random.normal(ks[4], (co,), jnp.float32) * 0.1
        rm = jax.random.normal(ks[5], (co,), jnp.float32) * 0.1
        rv = jax.random.uniform(ks[6], (co,), jnp.float32, minval=0.5, maxval=1.5)
        return x, weight, bias, bn_w, bn_b, rm, rv

    # Case 1/2: N=2, Ci=4, Co=8, 16x16, 3x3, pad 1 / 0 — lane-dense and ragged M.
    # Case 3: Ci=16, Co=16, stride=2, forced small tiles -> exercises the K
    #         reduction axis (n_k=2, accumulator path) and Co tiling (n_co=2).
    cases = [
        dict(n=2, ci=4, co=8, ksz=3, h=16, w=16, stride=1, pad=1, kw={}),
        dict(n=2, ci=4, co=8, ksz=3, h=16, w=16, stride=1, pad=0, kw={}),
        dict(n=2, ci=16, co=16, ksz=3, h=16, w=16, stride=2, pad=1,
             kw=dict(tile_k=128, tile_co=8)),
    ]

    for idx, c in enumerate(cases):
        x, weight, bias, bn_w, bn_b, rm, rv = make_params(
            jax.random.fold_in(key, idx), c["n"], c["ci"], c["co"], c["ksz"],
            c["h"], c["w"])
        out, scale, bits = qconv_bn_relu_forward(
            x, weight, bias, bn_w, bn_b, rm, rv,
            stride=c["stride"], padding=c["pad"], dilation=1, groups=1,
            **c["kw"])
        out = jax.block_until_ready(out)
        ref = jax.block_until_ready(
            _reference(x, weight, bias, bn_w, bn_b, rm, rv,
                       c["stride"], c["pad"], 1))
        assert out.shape == ref.shape, (out.shape, ref.shape)
        # bf16 inputs vs f32 reference (f32 accumulation) -> loosened tolerance.
        np.testing.assert_allclose(np.asarray(out, dtype=np.float32),
                                   np.asarray(ref),
                                   rtol=2e-2, atol=5e-2)
        assert scale is None and bits == 32

    # TODO(synk): quant_mode=True / eval_mode LSQ path (stateful scale init,
    # running-stat updates, straight-through round/clip) is training-time
    # machinery and is not implemented here.
    print("KERNEL_OK")
</pallas_src>

<mosaic_0001>
module attributes {stable_mosaic.version = 11 : i64} {
  func.func @_conv_matmul_kernel(%arg0: i32, %arg1: i32, %arg2: i32, %arg3: memref<8x40xbf16, #tpu.memory_space<vmem>>, %arg4: memref<40x256xbf16, #tpu.memory_space<vmem>>, %arg5: memref<8x1xf32, #tpu.memory_space<vmem>>, %arg6: memref<8x256xf32, #tpu.memory_space<vmem>>, %arg7: memref<8x256xf32, #tpu.memory_space<vmem>>) attributes {dimension_semantics = [#tpu.dimension_semantics<parallel>, #tpu.dimension_semantics<parallel>, #tpu.dimension_semantics<arbitrary>], iteration_bounds = array<i64: 1, 2, 1>, scalar_prefetch = 0 : i64, scratch_operands = 1 : i64, tpu.core_type = #tpu.core_type<tc>, window_params = [{pipeline_mode = #tpu.pipeline_mode<synchronous>, transform_indices = @transform_0, window_bounds = array<i64: 8, 40>}, {transform_indices = @transform_1, window_bounds = array<i64: 40, 256>}, {pipeline_mode = #tpu.pipeline_mode<synchronous>, transform_indices = @transform_2, window_bounds = array<i64: 8, 1>}, {transform_indices = @transform_3, window_bounds = array<i64: 8, 256>}]} {
    %c0_i32 = arith.constant 0 : i32
    %0 = arith.cmpi eq, %arg2, %c0_i32 : i32
    %1 = arith.extui %0 : i1 to i32
    %c0_i32_0 = arith.constant 0 : i32
    %2 = arith.cmpi ne, %1, %c0_i32_0 : i32
    scf.if %2 {
      %cst_10 = arith.constant 0.000000e+00 : f32
      %12 = vector.broadcast %cst_10 : f32 to vector<8x256xf32>
      %c0_11 = arith.constant 0 : index
      %c0_12 = arith.constant 0 : index
      %13 = vector.load %arg7[%c0_11, %c0_12] : memref<8x256xf32, #tpu.memory_space<vmem>>, vector<8x256xf32>
      tpu.vector_store %arg7[%c0_11, %c0_12], %12 {strides = array<i32>} : memref<8x256xf32, #tpu.memory_space<vmem>>, vector<8x256xf32>,
    } else {
    }
    %c0 = arith.constant 0 : index
    %c0_1 = arith.constant 0 : index
    %3 = vector.load %arg7[%c0, %c0_1] : memref<8x256xf32, #tpu.memory_space<vmem>>, vector<8x256xf32>
    %c0_2 = arith.constant 0 : index
    %c0_3 = arith.constant 0 : index
    %4 = vector.load %arg3[%c0_2, %c0_3] : memref<8x40xbf16, #tpu.memory_space<vmem>>, vector<8x40xbf16>
    %c0_4 = arith.constant 0 : index
    %c0_5 = arith.constant 0 : index
    %5 = vector.load %arg4[%c0_4, %c0_5] : memref<40x256xbf16, #tpu.memory_space<vmem>>, vector<40x256xbf16>
    %cst = arith.constant dense<0.000000e+00> : vector<8x256xf32>
    %6 = tpu.matmul %4, %5, %cst {dimension_numbers = #tpu.dot_dimension_numbers<[1], [0], [0], [1], [0, 0, 1, 1], [], []>} : vector<8x40xbf16>, vector<40x256xbf16>, vector<8x256xf32> -> vector<8x256xf32>
    %7 = arith.addf %3, %6 : vector<8x256xf32>
    %c0_6 = arith.constant 0 : index
    %c0_7 = arith.constant 0 : index
    %8 = vector.load %arg7[%c0_6, %c0_7] : memref<8x256xf32, #tpu.memory_space<vmem>>, vector<8x256xf32>
    tpu.vector_store %arg7[%c0_6, %c0_7], %7 {strides = array<i32>} : memref<8x256xf32, #tpu.memory_space<vmem>>, vector<8x256xf32>,
    %c0_i32_8 = arith.constant 0 : i32
    %9 = arith.cmpi eq, %arg2, %c0_i32_8 : i32
    %10 = arith.extui %9 : i1 to i32
    %c0_i32_9 = arith.constant 0 : i32
    %11 = arith.cmpi ne, %10, %c0_i32_9 : i32
    scf.if %11 {
      %c0_10 = arith.constant 0 : index
      %c0_11 = arith.constant 0 : index
      %12 = vector.load %arg7[%c0_10, %c0_11] : memref<8x256xf32, #tpu.memory_space<vmem>>, vector<8x256xf32>
      %c0_12 = arith.constant 0 : index
      %c0_13 = arith.constant 0 : index
      %13 = vector.load %arg5[%c0_12, %c0_13] : memref<8x1xf32, #tpu.memory_space<vmem>>, vector<8x1xf32>
      %14 = vector.broadcast %13 : vector<8x1xf32> to vector<8x256xf32>
      %15 = arith.addf %12, %14 : vector<8x256xf32>
      %c0_14 = arith.constant 0 : index
      %c0_15 = arith.constant 0 : index
      %16 = vector.load %arg6[%c0_14, %c0_15] : memref<8x256xf32, #tpu.memory_space<vmem>>, vector<8x256xf32>
      tpu.vector_store %arg6[%c0_14, %c0_15], %15 {strides = array<i32>} : memref<8x256xf32, #tpu.memory_space<vmem>>, vector<8x256xf32>,
    } else {
    }
    return
  }
  func.func @transform_0(%arg0: i32, %arg1: i32, %arg2: i32) -> (i32, i32) {
    %c0_i32 = arith.constant 0 : i32
    return %arg0, %arg2 : i32, i32
  }
  func.func @transform_1(%arg0: i32, %arg1: i32, %arg2: i32) -> (i32, i32) {
    %c0_i32 = arith.constant 0 : i32
    return %arg2, %arg1 : i32, i32
  }
  func.func @transform_2(%arg0: i32, %arg1: i32, %arg2: i32) -> (i32, i32) {
    %c0_i32 = arith.constant 0 : i32
    %c0_i32_0 = arith.constant 0 : i32
    return %arg0, %c0_i32 : i32, i32
  }
  func.func @transform_3(%arg0: i32, %arg1: i32, %arg2: i32) -> (i32, i32) {
    %c0_i32 = arith.constant 0 : i32
    return %arg0, %arg1 : i32, i32
  }
}

</mosaic_0001>

<bundles_post_ra>
// kernel: tpu_custom_call.1
= control target key start
LH: loop header
LB: loop body
LE: loop exit
PB: predicated region body
PF: predicated region fallthrough
CT: control target
= control target key end

     0   :  { %8 = vsyncpa [#allocation4], 0  ;;  %s931_s0 = inlined_call_operand.vmem [shape: bf16[8,40], index: 0, kind: input, shape index: {}]   ;;  %s932_s1 = inlined_call_operand.hbm [shape: bf16[40,512], index: 1, kind: input, shape index: {}]   ;;  %s933_s2 = inlined_call_operand.vmem [shape: f32[8,1], index: 2, kind: input, shape index: {}]   ;;  %s934_s3 = inlined_call_operand.hbm [shape: f32[8,512], index: 3, kind: output, shape index: {}]  }
   0x1   :  { %10 = vsyncpa [#allocation4 + $0x1], 0 }
   0x2   :  { %11 = vsyncpa [#allocation5], 0 }
   0x3   :  { %13 = vsyncpa [#allocation5 + $0x1], 0  ;;  %s753_s12 = smov 0   ;;  %s755_s13 = smov 0  }
   0x4   :  { %s757_s14 = smov 0   ;;  %s759_s15 = smov 0  }
   0x5   :  { %s761_s16 = smov 0   ;;  %s763_s17 = smov 0  }
   0x6 LB: > { %s511_s18 = sadd.s32 4294967295, %s725_s17   ;;  %s512_s19 = sadd.s32 4294967294, %s725_s17   ;;  %s725_s17 = sphi %s763_s17, %s19_s17   ;;  %s721_s16 = sphi %s761_s16, %s948_s16   ;;  %s717_s15 = sphi %s759_s15, %s947_s15   ;;  %s713_s14 = sphi %s757_s14, %s946_s14   ;;  %s709_s13 = sphi %s755_s13, %s945_s13   ;;  %s705_s12 = sphi %s753_s12, %s944_s12  }
   0x7   : > { %s34_s20 = sadd.s32 1, %s721_s16  ;;  %s75_s21 = sadd.s32 1, %s713_s14 }
   0x8   : > { %p36_p0 = scmp.ge.s32.totalorder %s34_s20, 2  ;;  %p82_p1 = scmp.ne.s32.totalorder %s713_s14, %s709_s13 }
   0x9   : > { %p83_p2 = scmp.eq.s32.totalorder %s725_s17, 0  ;;  %p88_p3 = scmp.ne.s32.totalorder %s709_s13, %s705_s12 }
   0xa   : > { %s950_s20 = smov (%p36_p0, %s34_s20), 0  ;;  %p89_p5 = scmp.eq.s32.totalorder %s511_s18, 0 }
   0xb   : > { %p794_p4 = por %p83_p2, %p82_p1  ;;  %s71_s23 = ssub.s32 %s721_s16, %s950_s20 }
   0xc   : > { %p140_p6 = scmp.eq.s32.totalorder %s511_s18, 1  ;;  %p73_p7 = scmp.eq.s32.totalorder %s71_s23, 0 }
   0xd   : > { %p800_p8 = por %p89_p5, %p88_p3  ;;  %p146_p10 = scmp.eq.s32.totalorder %s512_s19, 1 }
   0xe   : > { %p804_p9 = por %p140_p6, %p82_p1  ;;  %p550_p13 = scmp.lt.s32.totalorder %s725_s17, 2 }
   0xf   : > { %s809_s26 = scalar_select %p73_p7, %s713_s14, %s75_s21  }
  0x10   : > { %s938_s25 = scalar_select %p804_p9, 1, 0 }
  0x11   : > { %p811_p11 = por %p146_p10, %p88_p3  ;;  %s183_s28 = sand.u32 1, %s713_s14  }
  0x12   : > { %s536_s29 = smul.u32 40, %s183_s28  ;;  %s534_s30 = sshll.u32 %s721_s16, 7 }
  0x13   : > { %s939_s27 = scalar_select %p811_p11, 1, 0 }
  0x14   : > { %p821_p0 = pnand %p550_p13, %p794_p4  ;;  %s828_s7 = scalar_lea.hbm %s932_s1, %s534_s30 }
  0x15   : > { %s187_s8 = scalar_lea.vmem [#allocation3], %s536_s29  ;;  %s832_s10 = scalar_lea.sflag [#allocation4], %s183_s28 }
  0x16   : > { %s197_s9 = sshll.u32 %s187_s8, 4  ;;  %s613_s11 = scalar_lea.hbm %s828_s7, 640  ;;  %s830_s9 = int_to_ptr.vmem [resolvable:$true] %s197_s9 }
  0x17   : > { %p614_p1 = scmp.ne.s32.totalorder %s828_s7, %s613_s11  ;;  %p615_p2 = pneg %p821_p0 }
  0x18   : > { %s618_s21 = scalar_lea.hbm %s932_s1, 1280  ;;  %p619_p5 = scmp.lt.u32.totalorder %s828_s7, %s932_s1 }
  0x19   : > { %p616_p3 = pnand %p615_p2, %p614_p1  ;;  %p620_p6 = scmp.lt.u32.totalorder %s618_s21, %s613_s11 }
  0x1a   : > { %p622_p10 = scmp.lt.u32.totalorder %s613_s11, %s828_s7 }
  0x1b   : > { %p617_p4 = pneg %p616_p3  ;;  %p621_p7 = por %p620_p6, %p619_p5 }
  0x1d   : > { %p623_p13 = por %p622_p10, %p621_p7 }
  0x1f   : > { %p624_p12 = pnand %p623_p13, %p617_p4 }
  0x21   : > { %627 = shalt.err (!%p624_p12)
}
  0x22   : > { %s628_s28 = scalar_lea.vmem %s830_s9, 640  ;;  %s727_s29 = smov [#allocation3]  }
  0x23   : > { %p629_p1 = scmp.ne.s32.totalorder %s830_s9, %s628_s28  ;;  %s633_s30 = sshll.u32 %s727_s29, 4  ;;  %s634_s30 = int_to_ptr.vmem [resolvable:$false] %s633_s30 }
  0x24   : > { %s635_s5 = scalar_lea.vmem %s634_s30, 1280  ;;  %p636_p9 = scmp.lt.s32.totalorder %s830_s9, %s634_s30 }
  0x25   : > { %p631_p3 = pnand %p629_p1, %p615_p2  ;;  %p637_p5 = scmp.lt.s32.totalorder %s635_s5, %s628_s28 }
  0x27   : > { %p632_p11 = pneg %p631_p3  ;;  %p638_p6 = por %p637_p5, %p636_p9 }
  0x29   : > { %p639_p7 = pnand %p638_p6, %p632_p11 }
  0x2b   : > { %642 = shalt.err (!%p639_p7)
}
  0x2c   : > { %s728_s6 = smov 256   ;;  %s729_s8 = smov 128  }
  0x2d   : > { %s730_s11 = smov 8   ;;  %p519_p12 = scmp.ge.s32.totalorder %s725_s17, 1 }
  0x2e   : > { %545 = dma.hbm_to_vmem [thread:$0]  (!%p821_p0), %s828_s7, 640, %s830_s9, %s832_s10, %s728_s6, %s729_s8, %s730_s11  }
  0x2f   : > { %p205_p2 = scmp.lt.s32.totalorder %s725_s17, 3 }
  0x31   : > { %p206_p4 = pnand %p519_p12, %p205_p2 }
  0x32   : > { %s863_s18 = sand.u32 (!%p206_p4), 1, %s709_s13  }
  0x33   : > { %209 = sbr.rel (%p206_p4) target bundleno = 302 (0x12e), region = 32  ;;  %s212_s21 = scalar_lea.sflag (!%p206_p4), [#allocation4], %s863_s18 }
  0x34   : > { %s537_s19 = smul.u32 (!%p206_p4), 40, %s863_s18 }
  0x36   : > { %s215_s22 = scalar_lea.vmem (!%p206_p4), [#allocation3], %s537_s19 }
  0x3a   : > { %696 = dma.done.wait (%p800_p8), %s212_s21, 640  }
  0x3b   : > { %698 = vsyncadd (%p800_p8), %s212_s21, 4294966656  ;;  %v731_v0 = vmov 0   ;;  %v605_v1 = vld [vmem:[%s215_s22 + $0x4] ss:$8 sps:$4 sm:$0xff]   ;;  %v607_v2 = vld [vmem:[%s215_s22] ss:$8 sps:$4 sm:$0xff]  }
  0x3c   : > { %346 = vmatprep.mubr.bf16.mxu0 %v731_v0  ;;  %604 = vset.pattern.permute.xlu0 %v731_v0  ;;  %v608_v3 = vld [vmem:[%s215_s22 + $0x14] ss:$8 sps:$4 sm:$0xff]   ;;  %v277_v4 = vld [vmem:[%s215_s22 + $0x20] sm:$0xff]  ;;  %v610_v5 = vld [vmem:[%s215_s22 + $0x10] ss:$8 sps:$4 sm:$0xff]   ;;  %vm307_vm0 = vcmask 1043456  }
  0x3d   : > { %314 = vmatprep.subr.bf16.mxu0 %v605_v1  ;;  %v364_v6 = vld [vmem:[%s933_s2] sm:$0xff]  ;;  %v526_v7 = vcombine.high %v277_v4, %v277_v4  ;;  %v525_v8 = vcombine.low %v277_v4, %v277_v4  ;;  %vm303_vm1 = vcmask 326656   ;;  %s520_s10 = sshll.u32 %s863_s18, 4  ;;  %s535_s23 = sshll.u32 %s717_s15, 8 }
  0x3e   : > { %315 = vmatpush1.bf16.msra.mxu0 %v607_v2  ;;  %367 = vperm.xlu0 %604, %v364_v6   ;;  %v272_v10 = vld [vmem:[%s931_s0] sm:$0xf]  ;;  %s248_s28 = scalar_lea.vmem [#allocation6], %s520_s10  ;;  %s882_s6 = scalar_lea.hbm %s934_s3, %s535_s23 }
  0x3f   : > { %316 = vmatprep.subr.bf16.mxu0 %v608_v3  ;;  %v309_v9 = vsel %vm307_vm0, %v525_v8, 0  ;;  %s391_s29 = sshll.u32 %s248_s28, 4  ;;  %s375_s15 = scalar_lea.sflag [#allocation5], %s863_s18  ;;  %s884_s29 = int_to_ptr.vmem [resolvable:$true] %s391_s29 }
  0x40   : > { %s643_s8 = scalar_lea.vmem %s884_s29, 256  ;;  %p941_p9 = scmp.ne.s32.totalorder %s938_s25, 0 }
  0x41   : > { %p644_p8 = scmp.ne.s32.totalorder %s884_s29, %s643_s8  ;;  %s732_s11 = smov [#allocation6]  }
  0x42   : > { %317 = vmatpush1.bf16.msra.mxu0 %v610_v5  ;;  %s647_s19 = sshll.u32 %s732_s11, 4  ;;  %s648_s19 = int_to_ptr.vmem [resolvable:$false] %s647_s19 }
  0x43   : > { %527 = vmatprep.subr.msk.bf16.mxu0 %vm307_vm0, %v526_v7  ;;  %p645_p11 = pnand %p644_p8, %p941_p9  ;;  %s649_s21 = scalar_lea.vmem %s648_s19, 512 }
  0x44   : > { %p650_p10 = scmp.lt.s32.totalorder %s884_s29, %s648_s19  ;;  %p651_p13 = scmp.lt.s32.totalorder %s649_s21, %s643_s8 }
  0x45   : > { %p646_p0 = pneg %p645_p11 }
  0x46   : > { %319 = vmatpush1.bf16.msra.mxu0 %v309_v9  ;;  %p652_p1 = por %p651_p13, %p650_p10 }
  0x48   : > { %p653_p3 = pnand %p652_p1, %p646_p0 }
  0x49   : > { %528 = vmatmul.mubr.msk.bf16.vlgmr.msra.gmra.mrb[0].mxu0 %vm303_vm1, %v272_v10 }
  0xbd   : > { %v368_v11 = vpop.permute.xlu0 %367 }
 0x11c   : > { %v348_v12 = vpop.f32.mrb[0].mxu0 }
 0x11d   : > { %v370_v13 = vadd.f32 %v368_v11, %v348_v12  ;;  %v350_v14 = vpop.f32.mrb[1].mxu0 }
 0x11e   : > { %v371_v15 = vadd.f32 %v368_v11, %v350_v14  ;;  %v352_v16 = vpop.f32.mrb[2].mxu0 }
 0x11f   : > { %372 = vst [vmem:[%s248_s28] sm:$0xff] %v370_v13  ;;  %v353_v17 = vpop.f32.mrb[3].mxu0 }
 0x120   : > { %373 = vst [vmem:[%s248_s28 + $0x8] sm:$0xff] %v371_v15 }
 0x121   : > { %656 = shalt.err (!%p653_p3)
}
 0x122   : > { %s657_s18 = scalar_lea.hbm %s882_s6, 256  ;;  %s661_s7 = scalar_lea.hbm %s934_s3, 512 }
 0x123   : > { %p658_p5 = scmp.ne.s32.totalorder %s882_s6, %s657_s18  ;;  %p662_p12 = scmp.lt.u32.totalorder %s882_s6, %s934_s3 }
 0x124   : > { %p663_p2 = scmp.lt.u32.totalorder %s661_s7, %s657_s18  ;;  %p665_p8 = scmp.lt.u32.totalorder %s657_s18, %s882_s6 }
 0x125   : > { %p659_p6 = pnand %p658_p5, %p941_p9 }
 0x126   : > { %p664_p4 = por %p663_p2, %p662_p12 }
 0x127   : > { %p660_p7 = pneg %p659_p6 }
 0x128   : > { %p666_p11 = por %p665_p8, %p664_p4 }
 0x12a   : > { %p667_p0 = pnand %p666_p11, %p660_p7 }
 0x12c   : > { %670 = shalt.err (!%p667_p0)
}
 0x12d   : > { %540 = dma.vmem_to_hbm [thread:$0]  (%p941_p9), %s884_s29, 256, %s882_s6, %s375_s15  }
 0x12e PF: > { %s403_s10 = sand.u32 1, %s705_s12   ;;  %p942_p10 = scmp.ne.s32.totalorder %s939_s27, 0 }
 0x12f   : > { %p943_p13 = scmp.ge.s32.totalorder %s725_s17, 2  ;;  %s404_s23 = scalar_lea.sflag [#allocation5], %s403_s10 }
 0x131   : > { %p547_p1 = pnand %p943_p13, %p942_p10 }
 0x133   : > { %700 = dma.done.wait (!%p547_p1), %s404_s23, 256  }
 0x134   : > { %702 = vsyncadd (!%p547_p1), %s404_s23, 4294967040  ;;  %s19_s17 = sadd.s32 1, %s725_s17   ;;  %s944_s12 = smov %s709_s13 }
 0x135   : > { %p16_p3 = scmp.ge.s32.totalorder %s19_s17, 4   ;;  %s945_s13 = smov %s713_s14 }
 0x136   : > { %s946_s14 = smov %s809_s26  ;;  %s947_s15 = smov %s721_s16 }
 0x137   : > { %s948_s16 = smov %s950_s20  ;;  %18 = sbr.rel (!%p16_p3) target bundleno = 6 (0x6), region = 91 }
 0x13e   :  { %409 = vsyncpa [#allocation4], 1 }
 0x13f   :  { %411 = vsyncpa [#allocation4 + $0x1], 1 }
 0x140   :  { %412 = vsyncpa [#allocation5], 1 }
 0x141   :  { %414 = vsyncpa [#allocation5 + $0x1], 1 }

</bundles_post_ra>
